<compile_context>
chip_gen: v6e
topology: v6e:2x2x1
jax: 0.10.0
libtpu: 0.0.40
codegen_flags: <defaults>
</compile_context>

<pallas_src>
import functools

import jax
import jax.numpy as jnp
from jax.experimental import pallas as pl
from jax.experimental.pallas import tpu as pltpu


def _ce_loss_kernel(pred_ref, label_ref, out_ref, *, n_total):
    """One batch tile -> one f32 partial sum of per-row NLL."""
    tile_n, c = pred_ref.shape
    x = pred_ref[...]                       # (TN, C) native dtype (f32 or bf16)
    labels = label_ref[...]                 # (TN, 1) int32

    # Numerically stable log-softmax; the f32 upcast is fused into the
    # subtract (no standalone f32 copy of the whole tile is materialized).
    m = jnp.max(x, axis=-1, keepdims=True)                               # (TN,1)
    shifted = x.astype(jnp.float32) - m.astype(jnp.float32)              # (TN,C)
    lse = jnp.log(jnp.sum(jnp.exp(shifted), axis=-1, keepdims=True))     # (TN,1)

    # Gather shifted[n, label[n]] with compare+select (no one-hot multiply).
    class_ids = jax.lax.broadcasted_iota(jnp.int32, (tile_n, c), 1)
    picked = jnp.sum(jnp.where(class_ids == labels, shifted, 0.0),
                     axis=-1, keepdims=True)                             # (TN,1)

    nll = lse - picked                                                   # (TN,1)

    # Mask rows beyond the true batch size (partial last tile): boundary
    # garbage (possibly NaN/inf) is confined per-row and zeroed here.
    row_ids = (pl.program_id(0) * tile_n
               + jax.lax.broadcasted_iota(jnp.int32, (tile_n, 1), 0))
    nll = jnp.where(row_ids < n_total, nll, 0.0)

    # One aligned (8,128) store per tile; the wrapper reads element [0, 0].
    out_ref[...] = jnp.broadcast_to(jnp.sum(nll), out_ref.shape)


def _vmem_capacity_bytes():
    """Per-chip physical VMEM (128 MiB v5e/v6e, 64 MiB/TC v7x); safe fallback."""
    try:
        info = pltpu.get_tpu_info()
        cap = int(getattr(info, "vmem_capacity_bytes", 0))
        if cap > 0:
            return cap
    except Exception:
        pass
    return 64 * 1024 * 1024                 # conservative (v7x per-TC) fallback


def _pick_tile_n(n, c, itemsize, vmem_budget_bytes,
                 stream_target_bytes=16 * 1024 * 1024):
    """Largest sublane-aligned row tile satisfying both the per-tile logits
    stream target and the scoped-VMEM budget (2x input buffers + ~4x f32
    intermediates per row)."""
    per_row_stream = max(1, c * itemsize)
    per_row_vmem = max(1, c * (2 * itemsize + 4 * 4) + 2 * 4)
    tn = min(stream_target_bytes // per_row_stream,
             vmem_budget_bytes // per_row_vmem)
    tn = max(8, (tn // 8) * 8)
    n_pad = ((n + 7) // 8) * 8
    return min(tn, n_pad)


def ce_loss(pred, label, *, tile_n=None, vmem_limit_bytes=None):
    """Mean cross-entropy.

    pred:  [N, C] logits — f32 or bf16.  Feeding bf16 straight through is
           recommended (halves HBM traffic); all exp/log math is f32 in-kernel.
    label: [N] integer class indices in [0, C).
    """
    n, c = pred.shape
    label2d = label.astype(jnp.int32).reshape(n, 1)

    vmem_cap = _vmem_capacity_bytes()
    if vmem_limit_bytes is None:
        # ~80 MiB scoped on 128 MiB chips (v5e/v6e), ~40 MiB on v7x's 64 MiB/TC.
        vmem_limit_bytes = min((vmem_cap * 5) // 8, 96 * 1024 * 1024)

    auto_tile = tile_n is None
    if auto_tile:
        tile_n = _pick_tile_n(n, c, jnp.dtype(pred.dtype).itemsize,
                              (vmem_limit_bytes * 7) // 8)
    tile_n = max(8, (tile_n // 8) * 8)              # sublane-aligned batch tile

    num_tiles = pl.cdiv(n, tile_n)
    if auto_tile and num_tiles > 1:
        # Even tile count so v7x's two TensorCores get balanced work.
        num_tiles = ((num_tiles + 1) // 2) * 2
        tile_n = max(8, ((pl.cdiv(n, num_tiles) + 7) // 8) * 8)
        num_tiles = pl.cdiv(n, tile_n)

    kernel = functools.partial(_ce_loss_kernel, n_total=n)

    partials = pl.pallas_call(
        kernel,
        out_shape=jax.ShapeDtypeStruct((num_tiles, 8, 128), jnp.float32),
        grid_spec=pltpu.PrefetchScalarGridSpec(
            num_scalar_prefetch=0,
            grid=(num_tiles,),
            in_specs=[
                pl.BlockSpec((tile_n, c), lambda i: (i, 0)),   # logits stream
                pl.BlockSpec((tile_n, 1), lambda i: (i, 0)),   # labels
            ],
            out_specs=pl.BlockSpec((1, 8, 128), lambda i: (i, 0, 0)),
        ),
        compiler_params=pltpu.CompilerParams(
            dimension_semantics=("parallel",),   # shard tiles over v7x's 2 TCs
            vmem_limit_bytes=int(vmem_limit_bytes),
        ),
    )(pred, label2d)

    # Tiny final reduction over num_tiles partial sums; divide by the true N.
    return jnp.sum(partials[:, 0, 0]) / n


def _ce_loss_ref(pred, label):
    # pure-JAX reference (matches torch CrossEntropyLoss(reduction='mean'))
    logp = jax.nn.log_softmax(pred.astype(jnp.float32), axis=-1)
    picked = jnp.take_along_axis(logp, label[:, None].astype(jnp.int32), axis=-1)
    return -jnp.mean(picked)


if __name__ == "__main__":
    key = jax.random.PRNGKey(0)
    k1, k2 = jax.random.split(key)

    # Non-multiple-of-8 batch -> exercises the partial last tile + row masking.
    batch, num_classes = 26, 32
    pred = jax.random.normal(k1, (batch, num_classes), dtype=jnp.float32)
    label = jax.random.randint(k2, (batch,), 0, num_classes, dtype=jnp.int32)

    ref = _ce_loss_ref(pred, label)

    # Tiled / pipelined path: tile_n=8 -> 4 grid steps, last tile partial.
    loss_tiled = ce_loss(pred, label, tile_n=8)
    jax.block_until_ready(loss_tiled)
    assert jnp.allclose(loss_tiled, ref, atol=1e-5, rtol=1e-5), (loss_tiled, ref)

    # Auto (byte-sized) tile selection: single large tile at this size.
    loss_auto = ce_loss(pred, label)
    jax.block_until_ready(loss_auto)
    assert jnp.allclose(loss_auto, ref, atol=1e-5, rtol=1e-5), (loss_auto, ref)

    # bf16 logits fed straight through (recommended: halves HBM traffic).
    pred_bf16 = pred.astype(jnp.bfloat16)
    ref_bf16 = _ce_loss_ref(pred_bf16.astype(jnp.float32), label)
    loss_bf16 = ce_loss(pred_bf16, label, tile_n=8)
    jax.block_until_ready(loss_bf16)
    assert jnp.allclose(loss_bf16, ref_bf16, atol=1e-4, rtol=1e-4), (loss_bf16, ref_bf16)

    print("KERNEL_OK")
</pallas_src>

<mosaic_0001>
module attributes {stable_mosaic.version = 11 : i64} {
  func.func @_ce_loss_kernel(%arg0: i32, %arg1: memref<8x32xf32, #tpu.memory_space<vmem>>, %arg2: memref<8x1xi32, #tpu.memory_space<vmem>>, %arg3: memref<1x8x128xf32, #tpu.memory_space<vmem>>) attributes {dimension_semantics = [#tpu.dimension_semantics<parallel>], iteration_bounds = array<i64: 4>, scalar_prefetch = 0 : i64, scratch_operands = 0 : i64, tpu.core_type = #tpu.core_type<tc>, window_params = [{transform_indices = @transform_0, window_bounds = array<i64: 8, 32>}, {transform_indices = @transform_1, window_bounds = array<i64: 8, 1>}, {transform_indices = @transform_2, window_bounds = array<i64: 1, 8, 128>}]} {
    %c0 = arith.constant 0 : index
    %c0_0 = arith.constant 0 : index
    %0 = vector.load %arg1[%c0, %c0_0] : memref<8x32xf32, #tpu.memory_space<vmem>>, vector<8x32xf32>
    %c0_1 = arith.constant 0 : index
    %c0_2 = arith.constant 0 : index
    %1 = vector.load %arg2[%c0_1, %c0_2] : memref<8x1xi32, #tpu.memory_space<vmem>>, vector<8x1xi32>
    %cst = arith.constant dense<0xFF800000> : vector<8xf32>
    %2 = vector.multi_reduction <maximumf>, %0, %cst [1] : vector<8x32xf32> to vector<8xf32>
    %3 = vector.shape_cast %2 : vector<8xf32> to vector<8x1xf32>
    %4 = vector.broadcast %3 : vector<8x1xf32> to vector<8x32xf32>
    %5 = arith.subf %0, %4 : vector<8x32xf32>
    %6 = math.exp %5 : vector<8x32xf32>
    %cst_3 = arith.constant dense<0.000000e+00> : vector<8xf32>
    %7 = vector.multi_reduction <add>, %6, %cst_3 [1] : vector<8x32xf32> to vector<8xf32>
    %8 = vector.shape_cast %7 : vector<8xf32> to vector<8x1xf32>
    %9 = math.log %8 : vector<8x1xf32>
    %10 = tpu.iota {dimensions = array<i32: 1>} : vector<8x32xi32>
    %11 = vector.broadcast %1 : vector<8x1xi32> to vector<8x32xi32>
    %12 = arith.cmpi eq, %10, %11 : vector<8x32xi32>
    %cst_4 = arith.constant 0.000000e+00 : f32
    %13 = vector.broadcast %cst_4 : f32 to vector<8x32xf32>
    %14 = arith.select %12, %5, %13 : vector<8x32xi1>, vector<8x32xf32>
    %cst_5 = arith.constant dense<0.000000e+00> : vector<8xf32>
    %15 = vector.multi_reduction <add>, %14, %cst_5 [1] : vector<8x32xf32> to vector<8xf32>
    %16 = vector.shape_cast %15 : vector<8xf32> to vector<8x1xf32>
    %17 = arith.subf %9, %16 : vector<8x1xf32>
    %c8_i32 = arith.constant 8 : i32
    %18 = arith.muli %arg0, %c8_i32 : i32
    %19 = tpu.iota {dimensions = array<i32: 0>} : vector<8x1xi32>
    %20 = vector.broadcast %18 : i32 to vector<8x1xi32>
    %21 = arith.addi %20, %19 : vector<8x1xi32>
    %c26_i32 = arith.constant 26 : i32
    %22 = vector.broadcast %c26_i32 : i32 to vector<8x1xi32>
    %23 = arith.cmpi slt, %21, %22 : vector<8x1xi32>
    %cst_6 = arith.constant 0.000000e+00 : f32
    %24 = vector.broadcast %cst_6 : f32 to vector<8x1xf32>
    %25 = arith.select %23, %17, %24 : vector<8x1xi1>, vector<8x1xf32>
    %26 = vector.shape_cast %25 : vector<8x1xf32> to vector<1x8x1xf32>
    %cst_7 = arith.constant dense<0.000000e+00> : vector<1xf32>
    %27 = vector.multi_reduction <add>, %26, %cst_7 [1, 2] : vector<1x8x1xf32> to vector<1xf32>
    %28 = vector.shape_cast %27 : vector<1xf32> to vector<1x1x1xf32>
    %29 = vector.extract %28[0, 0, 0] : f32 from vector<1x1x1xf32>
    %30 = vector.broadcast %29 : f32 to vector<1x8x128xf32>
    %c0_8 = arith.constant 0 : index
    %c0_9 = arith.constant 0 : index
    %c0_10 = arith.constant 0 : index
    %31 = vector.load %arg3[%c0_8, %c0_9, %c0_10] : memref<1x8x128xf32, #tpu.memory_space<vmem>>, vector<1x8x128xf32>
    tpu.vector_store %arg3[%c0_8, %c0_9, %c0_10], %30 {strides = array<i32>} : memref<1x8x128xf32, #tpu.memory_space<vmem>>, vector<1x8x128xf32>,
    return
  }
  func.func @transform_0(%arg0: i32) -> (i32, i32) {
    %c0_i32 = arith.constant 0 : i32
    %c0_i32_0 = arith.constant 0 : i32
    return %arg0, %c0_i32 : i32, i32
  }
  func.func @transform_1(%arg0: i32) -> (i32, i32) {
    %c0_i32 = arith.constant 0 : i32
    %c0_i32_0 = arith.constant 0 : i32
    return %arg0, %c0_i32 : i32, i32
  }
  func.func @transform_2(%arg0: i32) -> (i32, i32, i32) {
    %c0_i32 = arith.constant 0 : i32
    %c0_i32_0 = arith.constant 0 : i32
    %c0_i32_1 = arith.constant 0 : i32
    return %arg0, %c0_i32, %c0_i32_0 : i32, i32, i32
  }
}

</mosaic_0001>

<bundles_post_ra>
// kernel: tpu_custom_call.1
= control target key start
LH: loop header
LB: loop body
LE: loop exit
PB: predicated region body
PF: predicated region fallthrough
CT: control target
= control target key end

     0   :  { %7 = vsyncpa [#allocation3], 0  ;;  %s524_s0 = inlined_call_operand.vmem [shape: f32[26,32], index: 0, kind: input, shape index: {}]   ;;  %s525_s1 = inlined_call_operand.vmem [shape: s32[26,1], index: 1, kind: input, shape index: {}]   ;;  %s526_s2 = inlined_call_operand.hbm [shape: f32[4,8,128], index: 2, kind: output, shape index: {}]  }
   0x1   :  { %9 = vsyncpa [#allocation3 + $0x1], 0  ;;  %s424_s9 = smov 0   ;;  %s426_s10 = smov 0  }
   0x2   :  { %s428_s11 = smov 0   ;;  %s430_s12 = smov 0  }
   0x3 LB: > { %s445_s13 = sadd.s32 4294967295, %s405_s12   ;;  %s286_s14 = sadd.s32 4294967294, %s405_s12   ;;  %s405_s12 = sphi %s430_s12, %s532_s12   ;;  %s401_s11 = sphi %s428_s11, %s531_s11   ;;  %s397_s10 = sphi %s426_s10, %s530_s10   ;;  %s393_s9 = sphi %s424_s9, %s529_s9  }
   0x4   : > { %s449_s15 = sadd.s32 1, %s405_s12   ;;  %s74_s16 = sadd.s32 1, %s401_s11 }
   0x5   : > { %s71_s17 = ssub.s32 %s405_s12, %s449_s15  ;;  %p84_p0 = scmp.ne.s32.totalorder %s401_s11, %s397_s10 }
   0x6   : > { %p72_p1 = scmp.eq.s32.totalorder %s71_s17, 0  ;;  %p85_p2 = scmp.eq.s32.totalorder %s445_s13, 3 }
   0x7   : > { %p90_p3 = scmp.ne.s32.totalorder %s397_s10, %s393_s9  ;;  %p91_p4 = scmp.eq.s32.totalorder %s286_s14, 3 }
   0x8   : > { %s460_s18 = scalar_select %p72_p1, %s401_s11, %s74_s16  }
   0x9   : > { %p462_p5 = por %p85_p2, %p84_p0  ;;  %p466_p6 = por %p91_p4, %p90_p3 }
   0xa   : > { %p289_p7 = scmp.ge.s32.totalorder %s405_s12, 1  ;;  %p123_p8 = scmp.lt.s32.totalorder %s405_s12, 5 }
   0xc   : > { %p124_p9 = pnand %p289_p7, %p123_p8 }
   0xd   : > { %p148_p10 = scmp.lt.s32.totalorder (!%p124_p9), %s445_s13, 3  ;;  %s293_s29 = sshll.u32 (!%p124_p9), %s445_s13, 3 }
   0xe   : > { %127 = sbr.rel (%p124_p9) target bundleno = 554 (0x22a), region = 28  ;;  %s145_s30 = sand.u32 (!%p124_p9), 1, %s397_s10  }
   0xf   : > { %s290_s3 = sshll.u32 (!%p124_p9), %s145_s30, 3  ;;  %s295_s6 = sshll.u32 (!%p124_p9), %s445_s13, 7 }
  0x10   : > { %s147_s4 = scalar_lea.vmem (!%p124_p9), [#allocation2], %s290_s3  ;;  %s213_s16 = scalar_lea.hbm (!%p124_p9), %s526_s2, %s295_s6 }
  0x11   : > { %s215_s5 = sshll.u32 (!%p124_p9), %s147_s4, 4  ;;  %s202_s17 = scalar_lea.sflag (!%p124_p9), [#allocation3], %s145_s30  ;;  %s486_s5 = int_to_ptr.vmem [resolvable:$true] %s215_s5 }
  0x13   : > { %v407_v0 = vmov 0   ;;  %s149_s21 = scalar_select %p148_p10, %s445_s13, 3  ;;  %vm158_vm0 = vcmask 261120   ;;  %v170_v7 = vlaneseq  ;;  %v184_v16 = vstv %s293_s29 }
  0x14   : > { %340 = vset.pattern.permute.xlu0 %v407_v0  ;;  %vm188_vm3 = vcmask 7168  }
  0x15   : > { %s291_s22 = sshll.u32 %s149_s21, 3  ;;  %v171_v8 = vand.u32 127, %v170_v7  ;;  %v183_v15 = vshrl.u32 %v170_v7, 7  ;;  %s345_s21 = scalar_lea.vmem %s486_s5, 128 }
  0x16   : > { %s151_s25 = scalar_lea.vmem %s524_s0, %s291_s22  ;;  %s155_s28 = scalar_lea.vmem %s525_s1, %s291_s22 }
  0x17   : > { %v156_v1 = vld [vmem:[%s151_s25] sm:$0xff]  ;;  %v185_v17 = vadd.s32 %v184_v16, %v183_v15  ;;  %p346_p11 = scmp.ne.s32.totalorder %s486_s5, %s345_s21  ;;  %s408_s22 = smov [#allocation2]  }
  0x18   : > { %v159_v2 = vsel %vm158_vm0, %v156_v1, -inf  ;;  %v157_v3 = vld [vmem:[%s155_s28] sm:$0xff]  ;;  %s349_s13 = sshll.u32 %s408_s22, 4  ;;  %s350_s13 = int_to_ptr.vmem [resolvable:$false] %s349_s13 }
  0x19   : > { %160 = vmax.xlane.f32.xlu0 %v159_v2  ;;  %vm186_vm2 = vcmp.lt.s32.totalorder %v185_v17, 26  ;;  %p347_p12 = pnand %p346_p11, %p462_p5  ;;  %s351_s23 = scalar_lea.vmem %s350_s13, 256 }
  0x1a   : > { %p352_p0 = scmp.lt.s32.totalorder %s486_s5, %s350_s13  ;;  %p353_p1 = scmp.lt.s32.totalorder %s351_s23, %s345_s21 }
  0x1b   : > { %p348_p13 = pneg %p347_p12 }
  0x1c   : > { %p354_p2 = por %p353_p1, %p352_p0 }
  0x1e   : > { %p355_p3 = pnand %p354_p2, %p348_p13 }
  0x2f   : > { %173 = vperm.xlu0 %340, %v157_v3  }
  0xa2   : > { %v161_v4 = vpop.xlane.xlu0 %160 }
  0xa3   : > { %v162_v5 = vsub.f32 %v156_v1, %v161_v4 }
  0xa5   : > { %v163_v6 = vmul.f32 1.442695, %v162_v5 }
  0xa7   : > { %341 = vpow2.f32 %v163_v6 }
  0xaa   : > { %v174_v9 = vpop.permute.xlu0 %173 }
  0xab   : > { %vm175_vm1 = vcmp.eq.s32.totalorder %v171_v8, %v174_v9 }
  0xac   : > { %v176_v12 = vsel %vm175_vm1, %v162_v5, 0.0 }
  0xad   : > { %v177_v13 = vsel %vm158_vm0, %v176_v12, 0.0 }
  0xb4   : > { %v342_v10 = vpop.eup %341 }
  0xb5   : > { %v165_v11 = vsel %vm158_vm0, %v342_v10, 0.0 }
  0xb6   : > { %166 = vadd.xlane.f32.xlu1 %v165_v11 }
  0xba   : > { %178 = vadd.xlane.f32.xlu1 %v177_v13 }
 0x13f   : > { %v167_v14 = vpop.xlane.xlu1 %166 }
 0x140   : > { %343 = vlog2.f32 %v167_v14 }
 0x143   : > { %v179_v20 = vpop.xlane.xlu1 %178 }
 0x14d   : > { %v344_v18 = vpop.eup %343 }
 0x14e   : > { %v169_v19 = vmul.f32 0.6931472, %v344_v18 }
 0x150   : > { %v180_v21 = vsub.f32 %v169_v19, %v179_v20 }
 0x152   : > { %v187_v22 = vsel %vm186_vm2, %v180_v21, 0.0 }
 0x153   : > { %v189_v23 = vsel %vm188_vm3, %v187_v22, 0.0 }
 0x154   : > { %190 = vadd.xlane.f32.xlu1 %v189_v23 }
 0x1dd   : > { %v191_v24 = vpop.xlane.xlu1 %190 }
 0x1de   : > { %v192_v25 = vrot.slane %v191_v24, 4 }
 0x1e0   : > { %v193_v26 = vadd.f32 %v192_v25, %v191_v24 }
 0x1e2   : > { %v194_v27 = vrot.slane %v193_v26, 2 }
 0x1e4   : > { %v195_v28 = vadd.f32 %v194_v27, %v193_v26 }
 0x1e6   : > { %v196_v29 = vrot.slane %v195_v28, 1 }
 0x1e8   : > { %v197_v30 = vadd.f32 %v196_v29, %v195_v28 }
 0x1ea   : > { %298 = vpush %v197_v30 }
 0x21b   : > { %s299_s7 = spop %298 }
 0x21c   : > { %v199_v31 = vstv %s299_s7 }
 0x21d   : > { %200 = vst [vmem:[%s147_s4] sm:$0xff] %v199_v31 }
 0x21e   : > { %358 = shalt.err (!%p355_p3)
}
 0x21f   : > { %s359_s24 = scalar_lea.hbm %s213_s16, 128  ;;  %s363_s27 = scalar_lea.hbm %s526_s2, 512 }
 0x220   : > { %p360_p4 = scmp.ne.s32.totalorder %s213_s16, %s359_s24  ;;  %p364_p9 = scmp.lt.s32.totalorder %s213_s16, %s526_s2 }
 0x221   : > { %p365_p10 = scmp.lt.s32.totalorder %s363_s27, %s359_s24 }
 0x222   : > { %p361_p7 = pnand %p360_p4, %p462_p5 }
 0x223   : > { %p366_p11 = por %p365_p10, %p364_p9 }
 0x224   : > { %p362_p8 = pneg %p361_p7 }
 0x226   : > { %p367_p12 = pnand %p366_p11, %p362_p8 }
 0x228   : > { %370 = shalt.err (!%p367_p12)
}
 0x229   : > { %300 = dma.vmem_to_hbm [thread:$0]  (%p462_p5), %s486_s5, 128, %s213_s16, %s202_s17  }
 0x22a PF: > { %p306_p13 = scmp.ge.s32.totalorder %s405_s12, 2  ;;  %s227_s30 = sand.u32 1, %s393_s9  }
 0x22b   : > { %s228_s3 = scalar_lea.sflag [#allocation3], %s227_s30 }
 0x22c   : > { %p303_p0 = pnand %p306_p13, %p466_p6 }
 0x22e   : > { %p304_p1 = pneg %p303_p0 }
 0x230   : > { %388 = dma.done.wait (%p304_p1), %s228_s3, 128  }
 0x231   : > { %390 = vsyncadd (%p304_p1), %s228_s3, 4294967168  ;;  %p12_p2 = scmp.ge.s32.totalorder %s449_s15, 6   ;;  %s529_s9 = smov %s397_s10 }
 0x232   : > { %s530_s10 = smov %s401_s11  ;;  %s531_s11 = smov %s460_s18 }
 0x233   : > { %s532_s12 = smov %s449_s15  ;;  %14 = sbr.rel (!%p12_p2) target bundleno = 3 (0x3), region = 66 }
 0x238   :  { %233 = vsyncpa [#allocation3], 1 }
 0x239   :  { %235 = vsyncpa [#allocation3 + $0x1], 1 }

</bundles_post_ra>
